<compile_context>
chip_gen: v7x
topology: tpu7x:2x2x1
jax: 0.10.0
libtpu: 0.0.40
codegen_flags: <defaults>
</compile_context>

<pallas_src>
import jax
import jax.numpy as jnp
from jax.experimental import pallas as pl
from jax.experimental.pallas import tpu as pltpu

IN_F = 768
HID_F = 512
OUT_F = 256


def dense_kernel(x_ref, w1_ref, b1_ref, w2_ref, b2_ref, o_ref):
    # x arrives as f32 (single HBM stream); cast to bf16 right before the MXU.
    x = x_ref[...].astype(jnp.bfloat16)
    # fc1: bf16 x bf16 -> f32 accumulation on the MXU; bias + ReLU on the VPU.
    h = jnp.dot(x, w1_ref[...], preferred_element_type=jnp.float32)
    h = jnp.maximum(h + b1_ref[...], 0.0)                     # (tb,512)+(1,512)
    # fc2: feed the MXU bf16 again, accumulate in f32.
    y = jnp.dot(h.astype(jnp.bfloat16), w2_ref[...],
                preferred_element_type=jnp.float32)
    y = y + b2_ref[...]                                       # (tb,256)+(1,256)
    # torch.round(torch.sigmoid(y)): sigmoid(y) > 0.5 iff y > 0, and
    # sigmoid(0)=0.5 rounds half-to-even to 0  =>  output is 1 exactly when y>0.
    o_ref[...] = jnp.where(y > 0.0, 1.0, 0.0).astype(o_ref.dtype)


def _round_up(n, m):
    return ((n + m - 1) // m) * m


def _invariant_spec(shape):
    """Grid-invariant operand: constant index_map, single-buffered if supported."""
    idx = lambda i: (0, 0)
    try:
        return pl.BlockSpec(shape, idx, pipeline_mode=pl.Buffered(1))
    except (TypeError, AttributeError):   # older BlockSpec without pipeline_mode
        return pl.BlockSpec(shape, idx)


def _default_batch_tile():
    try:
        kind = jax.devices()[0].device_kind.lower()
    except Exception:
        return 512
    if "v7" in kind:
        return 512            # 64 MiB VMEM per TensorCore -> keep tiles modest
    if "v5" in kind or "v6" in kind:
        return 1024           # 128 MiB VMEM: fewer, larger grid steps
    return 512


def prepare_dense_params(w1, b1, w2, b2):
    """One-time (init-time) parameter transform.

    In: PyTorch nn.Linear layout  w1 (512,768), b1 (512,), w2 (256,512), b2 (256,).
    Out: (in_features, out_features) bf16 weights + (1, out) f32 biases.
    """
    return (
        jnp.asarray(w1).T.astype(jnp.bfloat16),                 # (768, 512)
        jnp.asarray(b1).reshape(1, HID_F).astype(jnp.float32),  # (1, 512)
        jnp.asarray(w2).T.astype(jnp.bfloat16),                 # (512, 256)
        jnp.asarray(b2).reshape(1, OUT_F).astype(jnp.float32),  # (1, 256)
    )


def dense_forward(x, params, *, tb=None, out_dtype=jnp.bfloat16):
    """Forward pass.  x: (B, 768) float32; params from prepare_dense_params.

    Returns (B, 256) of exact {0.0, 1.0} values in `out_dtype` (bf16 default;
    both values are exactly representable)."""
    w1_t, b1_2d, w2_t, b2_2d = params
    B = x.shape[0]
    if tb is None:
        tb = _default_batch_tile()

    # Batch tile: 128-aligned once B is large enough (clean MXU M-passes and
    # unmasked stores), 16-aligned below that, and sized so the grid has >= 2
    # steps when B allows (keeps both v7x TensorCores busy).  Tiny batches use
    # a full-array block, which is always a legal block shape.
    align = 128 if B >= 256 else 16
    if B <= align:
        tb_eff = B
    else:
        tb_eff = min(tb, max(align, _round_up(pl.cdiv(B, 2), align)))
    grid = (pl.cdiv(B, tb_eff),)   # ragged last block is masked by Pallas

    return pl.pallas_call(
        dense_kernel,
        out_shape=jax.ShapeDtypeStruct((B, OUT_F), out_dtype),
        grid_spec=pltpu.PrefetchScalarGridSpec(
            num_scalar_prefetch=0,
            grid=grid,
            in_specs=[
                pl.BlockSpec((tb_eff, IN_F), lambda i: (i, 0)),
                _invariant_spec((IN_F, HID_F)),
                _invariant_spec((1, HID_F)),
                _invariant_spec((HID_F, OUT_F)),
                _invariant_spec((1, OUT_F)),
            ],
            out_specs=pl.BlockSpec((tb_eff, OUT_F), lambda i: (i, 0)),
        ),
        compiler_params=pltpu.CompilerParams(
            dimension_semantics=("parallel",),
            # <= ~12 MiB live even at tb=1024 (double-buffered f32 x tile +
            # single-buffered bf16 weights + f32 intermediates); 32 MiB fits
            # every generation's scoped VMEM, including v7x.
            vmem_limit_bytes=32 * 1024 * 1024,
        ),
    )(x, w1_t, b1_2d, w2_t, b2_2d)


if __name__ == "__main__":
    key = jax.random.PRNGKey(0)
    kx, k1, k2, k3, k4 = jax.random.split(key, 5)

    batch = 8
    x = jax.random.normal(kx, (batch, IN_F), dtype=jnp.float32)

    # PyTorch nn.Linear layouts: W1 (512, 768), W2 (256, 512).
    w1 = jax.random.uniform(k1, (HID_F, IN_F), jnp.float32, -0.03, 0.03)
    b1 = jax.random.uniform(k2, (HID_F,), jnp.float32, -0.03, 0.03)
    w2 = jax.random.uniform(k3, (OUT_F, HID_F), jnp.float32, -0.04, 0.04)
    b2 = jax.random.uniform(k4, (OUT_F,), jnp.float32, -0.04, 0.04)

    params = prepare_dense_params(w1, b1, w2, b2)   # one-time init transform
    out = jax.block_until_ready(dense_forward(x, params))
    assert out.shape == (batch, OUT_F)
    out_f32 = out.astype(jnp.float32)

    # Pure-JAX reference computing exactly what the kernel computes (bf16 MXU
    # feeds, f32 accumulation), up to accumulation order.
    xb = x.astype(jnp.bfloat16).astype(jnp.float32)
    w1b = w1.astype(jnp.bfloat16).astype(jnp.float32)
    w2b = w2.astype(jnp.bfloat16).astype(jnp.float32)
    h_ref = jnp.maximum(xb @ w1b.T + b1, 0.0)
    y_ref = h_ref.astype(jnp.bfloat16).astype(jnp.float32) @ w2b.T + b2
    out_ref = jnp.where(y_ref > 0.0, 1.0, 0.0)

    # Ignore elements whose pre-activation is within accumulation-order noise
    # of the 0/1 decision boundary (inherent to any low-precision variant).
    decisive = jnp.abs(y_ref) > 1e-3
    assert bool(jnp.all((out_f32 == 0.0) | (out_f32 == 1.0)))
    assert bool(jnp.all(jnp.where(decisive, out_f32 == out_ref, True))), \
        "mismatch vs reference"

    print("KERNEL_OK")
</pallas_src>

<mosaic_0001>
module attributes {stable_mosaic.version = 11 : i64} {
  func.func @dense_kernel(%arg0: i32, %arg1: memref<8x768xf32, #tpu.memory_space<vmem>>, %arg2: memref<768x512xbf16, #tpu.memory_space<vmem>>, %arg3: memref<1x512xf32, #tpu.memory_space<vmem>>, %arg4: memref<512x256xbf16, #tpu.memory_space<vmem>>, %arg5: memref<1x256xf32, #tpu.memory_space<vmem>>, %arg6: memref<8x256xbf16, #tpu.memory_space<vmem>>) attributes {dimension_semantics = [#tpu.dimension_semantics<parallel>], iteration_bounds = array<i64: 1>, scalar_prefetch = 0 : i64, scratch_operands = 0 : i64, tpu.core_type = #tpu.core_type<tc>, window_params = [{transform_indices = @transform_0, window_bounds = array<i64: 8, 768>}, {pipeline_mode = #tpu.pipeline_mode<synchronous>, transform_indices = @transform_1, window_bounds = array<i64: 768, 512>}, {pipeline_mode = #tpu.pipeline_mode<synchronous>, transform_indices = @transform_2, window_bounds = array<i64: 1, 512>}, {pipeline_mode = #tpu.pipeline_mode<synchronous>, transform_indices = @transform_3, window_bounds = array<i64: 512, 256>}, {pipeline_mode = #tpu.pipeline_mode<synchronous>, transform_indices = @transform_4, window_bounds = array<i64: 1, 256>}, {transform_indices = @transform_5, window_bounds = array<i64: 8, 256>}]} {
    %c0 = arith.constant 0 : index
    %c0_0 = arith.constant 0 : index
    %0 = vector.load %arg1[%c0, %c0_0] : memref<8x768xf32, #tpu.memory_space<vmem>>, vector<8x768xf32>
    %1 = arith.truncf %0 : vector<8x768xf32> to vector<8x768xbf16>
    %c0_1 = arith.constant 0 : index
    %c0_2 = arith.constant 0 : index
    %2 = vector.load %arg2[%c0_1, %c0_2] : memref<768x512xbf16, #tpu.memory_space<vmem>>, vector<768x512xbf16>
    %cst = arith.constant dense<0.000000e+00> : vector<8x512xf32>
    %3 = tpu.matmul %1, %2, %cst {dimension_numbers = #tpu.dot_dimension_numbers<[1], [0], [0], [1], [0, 0, 1, 1], [], []>} : vector<8x768xbf16>, vector<768x512xbf16>, vector<8x512xf32> -> vector<8x512xf32>
    %c0_3 = arith.constant 0 : index
    %c0_4 = arith.constant 0 : index
    %4 = vector.load %arg3[%c0_3, %c0_4] : memref<1x512xf32, #tpu.memory_space<vmem>>, vector<1x512xf32>
    %5 = vector.broadcast %4 : vector<1x512xf32> to vector<8x512xf32>
    %6 = arith.addf %3, %5 : vector<8x512xf32>
    %cst_5 = arith.constant 0.000000e+00 : f32
    %7 = vector.broadcast %cst_5 : f32 to vector<8x512xf32>
    %8 = arith.maximumf %6, %7 : vector<8x512xf32>
    %9 = arith.truncf %8 : vector<8x512xf32> to vector<8x512xbf16>
    %c0_6 = arith.constant 0 : index
    %c0_7 = arith.constant 0 : index
    %10 = vector.load %arg4[%c0_6, %c0_7] : memref<512x256xbf16, #tpu.memory_space<vmem>>, vector<512x256xbf16>
    %cst_8 = arith.constant dense<0.000000e+00> : vector<8x256xf32>
    %11 = tpu.matmul %9, %10, %cst_8 {dimension_numbers = #tpu.dot_dimension_numbers<[1], [0], [0], [1], [0, 0, 1, 1], [], []>} : vector<8x512xbf16>, vector<512x256xbf16>, vector<8x256xf32> -> vector<8x256xf32>
    %c0_9 = arith.constant 0 : index
    %c0_10 = arith.constant 0 : index
    %12 = vector.load %arg5[%c0_9, %c0_10] : memref<1x256xf32, #tpu.memory_space<vmem>>, vector<1x256xf32>
    %13 = vector.broadcast %12 : vector<1x256xf32> to vector<8x256xf32>
    %14 = arith.addf %11, %13 : vector<8x256xf32>
    %cst_11 = arith.constant 0.000000e+00 : f32
    %15 = vector.broadcast %cst_11 : f32 to vector<8x256xf32>
    %16 = arith.cmpf ogt, %14, %15 : vector<8x256xf32>
    %cst_12 = arith.constant 1.000000e+00 : f32
    %cst_13 = arith.constant 0.000000e+00 : f32
    %17 = vector.broadcast %cst_12 : f32 to vector<8x256xf32>
    %18 = vector.broadcast %cst_13 : f32 to vector<8x256xf32>
    %19 = arith.select %16, %17, %18 : vector<8x256xi1>, vector<8x256xf32>
    %20 = arith.truncf %19 : vector<8x256xf32> to vector<8x256xbf16>
    %c0_14 = arith.constant 0 : index
    %c0_15 = arith.constant 0 : index
    %21 = vector.load %arg6[%c0_14, %c0_15] : memref<8x256xbf16, #tpu.memory_space<vmem>>, vector<8x256xbf16>
    tpu.vector_store %arg6[%c0_14, %c0_15], %20 {strides = array<i32>} : memref<8x256xbf16, #tpu.memory_space<vmem>>, vector<8x256xbf16>,
    return
  }
  func.func @transform_0(%arg0: i32) -> (i32, i32) {
    %c0_i32 = arith.constant 0 : i32
    %c0_i32_0 = arith.constant 0 : i32
    return %arg0, %c0_i32 : i32, i32
  }
  func.func @transform_1(%arg0: i32) -> (i32, i32) {
    %c0_i32 = arith.constant 0 : i32
    %c0_i32_0 = arith.constant 0 : i32
    %c0_i32_1 = arith.constant 0 : i32
    return %c0_i32, %c0_i32_0 : i32, i32
  }
  func.func @transform_2(%arg0: i32) -> (i32, i32) {
    %c0_i32 = arith.constant 0 : i32
    %c0_i32_0 = arith.constant 0 : i32
    %c0_i32_1 = arith.constant 0 : i32
    return %c0_i32, %c0_i32_0 : i32, i32
  }
  func.func @transform_3(%arg0: i32) -> (i32, i32) {
    %c0_i32 = arith.constant 0 : i32
    %c0_i32_0 = arith.constant 0 : i32
    %c0_i32_1 = arith.constant 0 : i32
    return %c0_i32, %c0_i32_0 : i32, i32
  }
  func.func @transform_4(%arg0: i32) -> (i32, i32) {
    %c0_i32 = arith.constant 0 : i32
    %c0_i32_0 = arith.constant 0 : i32
    %c0_i32_1 = arith.constant 0 : i32
    return %c0_i32, %c0_i32_0 : i32, i32
  }
  func.func @transform_5(%arg0: i32) -> (i32, i32) {
    %c0_i32 = arith.constant 0 : i32
    %c0_i32_0 = arith.constant 0 : i32
    return %arg0, %c0_i32 : i32, i32
  }
}

</mosaic_0001>

<bundles_post_ra>
// kernel: tpu_custom_call.1
= control target key start
LH: loop header
LB: loop body
LE: loop exit
PB: predicated region body
PF: predicated region fallthrough
CT: control target
= control target key end

     0   :  { %10 = vsyncpa [#allocation3], 0  ;;  %s2913_s0 = inlined_call_operand.hbm [shape: f32[8,768], index: 0, kind: input, shape index: {}]   ;;  %s2914_s1 = inlined_call_operand.hbm [shape: bf16[768,512], index: 1, kind: input, shape index: {}]   ;;  %s2915_s2 = inlined_call_operand.vmem [shape: f32[1,512], index: 2, kind: input, shape index: {}]   ;;  %s2916_s3 = inlined_call_operand.hbm [shape: bf16[512,256], index: 3, kind: input, shape index: {}]   ;;  %s2917_s4 = inlined_call_operand.vmem [shape: f32[1,256], index: 4, kind: input, shape index: {}]   ;;  %s2918_s5 = inlined_call_operand.hbm [shape: bf16[8,256], index: 5, kind: output, shape index: {}]  }
   0x1   :  { %11 = vsyncpa [#allocation6], 0 }
   0x2   :  { %12 = vsyncpa [#allocation4], 0  ;;  %s2776_s18 = smov [#allocation5]   ;;  %s2682_s22 = scalar_lea.hbm %s2914_s1, 24576 }
   0x3   :  { %s28_s19 = sshll.u32 %s2776_s18, 4  ;;  %p2683_p0 = scmp.ne.s32.totalorder %s2914_s1, %s2682_s22  ;;  %s29_s19 = int_to_ptr.vmem [resolvable:$true] %s28_s19 }
   0x4   :  { %p2686_p1 = scmp.lt.u32.totalorder %s2682_s22, %s2914_s1 }
   0x6   :  { %p2688_p2 = pnand %p2686_p1, %p2683_p0 }
   0x8   :  { %2691 = shalt.err (!%p2688_p2)
}
   0x9   :  { %s2692_s27 = scalar_lea.vmem %s29_s19, 24576  ;;  %p2697_p4 = scmp.lt.s32.totalorder %s29_s19, %s29_s19 }
   0xa   :  { %p2693_p3 = scmp.ne.s32.totalorder %s29_s19, %s2692_s27  ;;  %p2698_p5 = scmp.lt.s32.totalorder %s2692_s27, %s2692_s27 }
   0xc   :  { %p2699_p6 = por %p2698_p5, %p2697_p4 }
   0xe   :  { %p2700_p7 = pnand %p2699_p6, %p2693_p3 }
  0x10   :  { %2703 = shalt.err (!%p2700_p7)
}
  0x11   :  { %s2777_s28 = smov 256   ;;  %s2778_s29 = smov 16  }
  0x12   :  { %34 = dma.hbm_to_vmem [thread:$0]  %s2914_s1, 24576, %s29_s19, [#allocation6], %s2777_s28, %s2777_s28, %s2778_s29  }
  0x13   :  { %s2779_s7 = smov [#allocation2]   ;;  %s2780_s9 = smov [#allocation7]  }
  0x14   :  { %s19_s8 = sshll.u32 %s2779_s7, 4  ;;  %s42_s10 = sshll.u32 %s2780_s9, 4  ;;  %s20_s8 = int_to_ptr.vmem [resolvable:$true] %s19_s8  ;;  %s43_s10 = int_to_ptr.vmem [resolvable:$true] %s42_s10 }
  0x15   :  { %s2704_s13 = scalar_lea.hbm %s2913_s0, 768 }
  0x16   :  { %p2705_p8 = scmp.ne.s32.totalorder %s2913_s0, %s2704_s13  ;;  %p2708_p9 = scmp.lt.u32.totalorder %s2704_s13, %s2913_s0 }
  0x18   :  { %p2710_p10 = pnand %p2708_p9, %p2705_p8 }
  0x1a   :  { %2713 = shalt.err (!%p2710_p10)
}
  0x1b   :  { %s2714_s1 = scalar_lea.vmem %s20_s8, 768  ;;  %p2719_p12 = scmp.lt.s32.totalorder %s20_s8, %s20_s8 }
  0x1c   :  { %p2715_p11 = scmp.ne.s32.totalorder %s20_s8, %s2714_s1  ;;  %p2720_p13 = scmp.lt.s32.totalorder %s2714_s1, %s2714_s1 }
  0x1e   :  { %p2721_p0 = por %p2720_p13, %p2719_p12 }
  0x20   :  { %p2722_p1 = pnand %p2721_p0, %p2715_p11 }
  0x22   :  { %2725 = shalt.err (!%p2722_p1)
}
  0x23   :  { %22 = dma.hbm_to_vmem [thread:$0]  %s2913_s0, 768, %s20_s8, [#allocation3]  }
  0x24   :  { %s2726_s22 = scalar_lea.hbm %s2916_s3, 8192 }
  0x25   :  { %p2727_p2 = scmp.ne.s32.totalorder %s2916_s3, %s2726_s22  ;;  %p2730_p3 = scmp.lt.u32.totalorder %s2726_s22, %s2916_s3 }
  0x27   :  { %p2732_p4 = pnand %p2730_p3, %p2727_p2 }
  0x29   :  { %2735 = shalt.err (!%p2732_p4)
}
  0x2a   :  { %s2736_s27 = scalar_lea.vmem %s43_s10, 8192  ;;  %p2741_p6 = scmp.lt.s32.totalorder %s43_s10, %s43_s10 }
  0x2b   :  { %p2737_p5 = scmp.ne.s32.totalorder %s43_s10, %s2736_s27  ;;  %p2742_p7 = scmp.lt.s32.totalorder %s2736_s27, %s2736_s27 }
  0x2d   :  { %p2743_p8 = por %p2742_p7, %p2741_p6 }
  0x2f   :  { %p2744_p9 = pnand %p2743_p8, %p2737_p5 }
  0x31   :  { %2747 = shalt.err (!%p2744_p9)
}
  0x32   :  { %s2781_s0 = smov 128   ;;  %s2782_s28 = smov 8  }
  0x33   :  { %48 = dma.hbm_to_vmem [thread:$0]  %s2916_s3, 8192, %s43_s10, [#allocation6], %s2781_s0, %s2781_s0, %s2782_s28  }
  0x34   :  { %2770 = dma.done.wait [#allocation3], 768  }
  0x35   :  { %2771 = vsyncadd [#allocation3], 4294966528 }
  0x36   :  { %2772 = dma.done.wait [#allocation6], 32768  }
  0x37   :  { %2773 = vsyncadd [#allocation6], 4294934528  ;;  %v2298_v0 = vld [vmem:[#allocation5 + $0x4] ss:$16 sps:$4 sm:$0xff]   ;;  %v2302_v2 = vld [vmem:[#allocation5] ss:$16 sps:$4 sm:$0xff]  }
  0x38   :  { %v2300_v1 = vld [vmem:[#allocation5 + $0x204] ss:$16 sps:$4 sm:$0xff]   ;;  %1246 = vmatprep.subr.bf16.mxu1 %v2298_v0  ;;  %v2303_v3 = vld [vmem:[#allocation5 + $0x200] ss:$16 sps:$4 sm:$0xff]   ;;  %v61_v46 = vld [vmem:[#allocation2 + $0x8] sm:$0xff]  ;;  %s2783_s8 = smov [#allocation8]  }
  0x39   :  { %1287 = vmatprep.subr.bf16.mxu0 %v2300_v1  ;;  %v2304_v4 = vld [vmem:[#allocation5 + $0x24] ss:$16 sps:$4 sm:$0xff]   ;;  %1247 = vmatpush1.bf16.msra.mxu1 %v2302_v2  ;;  %v2308_v6 = vld [vmem:[#allocation5 + $0x20] ss:$16 sps:$4 sm:$0xff]   ;;  %v2851_v48 = vpack.c.bf16 %v61_v46, %v61_v46  ;;  %v63_v49 = vld [vmem:[#allocation2 + $0x18] sm:$0xff]  ;;  %s1997_s9 = sshll.u32 %s2783_s8, 4  ;;  %s1998_s9 = int_to_ptr.vmem [resolvable:$true] %s1997_s9 }
  0x3a   :  { %1288 = vmatpush1.bf16.msra.mxu0 %v2303_v3  ;;  %v2306_v5 = vld [vmem:[#allocation5 + $0x224] ss:$16 sps:$4 sm:$0xff]   ;;  %1248 = vmatprep.subr.bf16.mxu1 %v2304_v4  ;;  %v2309_v7 = vld [vmem:[#allocation5 + $0x220] ss:$16 sps:$4 sm:$0xff]   ;;  %v2853_v52 = vpack.c.bf16 %v63_v49, %v63_v49  ;;  %v2451_v49 = vld [vmem:[#allocation5 + $0x128] ss:$16 sps:$4 sm:$0xff]   ;;  %p2753_p11 = scmp.lt.s32.totalorder %s1998_s9, %s1998_s9 }
  0x3b   :  { %1289 = vmatprep.subr.bf16.mxu0 %v2306_v5  ;;  %v2310_v8 = vld [vmem:[#allocation5 + $0x44] ss:$16 sps:$4 sm:$0xff]   ;;  %v2314_v10 = vld [vmem:[#allocation5 + $0x40] ss:$16 sps:$4 sm:$0xff]   ;;  %1278 = vmatprep.mubr.bf16.mxu1 %v2851_v48 }
  0x3c   :  { %v2312_v9 = vld [vmem:[#allocation5 + $0x244] ss:$16 sps:$4 sm:$0xff]   ;;  %v2315_v11 = vld [vmem:[#allocation5 + $0x240] ss:$16 sps:$4 sm:$0xff]   ;;  %1319 = vmatprep.mubr.bf16.mxu0 %v2853_v52 }
  0x3d   :  { %1249 = vmatpush1.bf16.msra.mxu1 %v2308_v6  ;;  %v2316_v12 = vld [vmem:[#allocation5 + $0x64] ss:$16 sps:$4 sm:$0xff]   ;;  %v2320_v14 = vld [vmem:[#allocation5 + $0x60] ss:$16 sps:$4 sm:$0xff]  }
  0x3e   :  { %1290 = vmatpush1.bf16.msra.mxu0 %v2309_v7  ;;  %1250 = vmatprep.subr.bf16.mxu1 %v2310_v8  ;;  %v2318_v13 = vld [vmem:[#allocation5 + $0x264] ss:$16 sps:$4 sm:$0xff]   ;;  %v2321_v15 = vld [vmem:[#allocation5 + $0x260] ss:$16 sps:$4 sm:$0xff]   ;;  %v2399_v7 = vld [vmem:[#allocation5 + $0xc] ss:$16 sps:$4 sm:$0xff]  }
  0x3f   :  { %1291 = vmatprep.subr.bf16.mxu0 %v2312_v9  ;;  %v2322_v16 = vld [vmem:[#allocation5 + $0x84] ss:$16 sps:$4 sm:$0xff]   ;;  %v2326_v18 = vld [vmem:[#allocation5 + $0x80] ss:$16 sps:$4 sm:$0xff]  }
  0x40   :  { %v2324_v17 = vld [vmem:[#allocation5 + $0x284] ss:$16 sps:$4 sm:$0xff]   ;;  %v2327_v19 = vld [vmem:[#allocation5 + $0x280] ss:$16 sps:$4 sm:$0xff]  }
  0x41   :  { %1251 = vmatpush1.bf16.msra.mxu1 %v2314_v10  ;;  %v2328_v20 = vld [vmem:[#allocation5 + $0xa4] ss:$16 sps:$4 sm:$0xff]   ;;  %v2332_v22 = vld [vmem:[#allocation5 + $0xa0] ss:$16 sps:$4 sm:$0xff]   ;;  %v2397_v10 = vld [vmem:[#allocation5 + $0x8] ss:$16 sps:$4 sm:$0xff]  }
  0x42   :  { %1292 = vmatpush1.bf16.msra.mxu0 %v2315_v11  ;;  %1252 = vmatprep.subr.bf16.mxu1 %v2316_v12  ;;  %v2330_v21 = vld [vmem:[#allocation5 + $0x2a4] ss:$16 sps:$4 sm:$0xff]   ;;  %v2333_v23 = vld [vmem:[#allocation5 + $0x2a0] ss:$16 sps:$4 sm:$0xff]  }
  0x43   :  { %1293 = vmatprep.subr.bf16.mxu0 %v2318_v13  ;;  %v2334_v24 = vld [vmem:[#allocation5 + $0xc4] ss:$16 sps:$4 sm:$0xff]   ;;  %v2338_v26 = vld [vmem:[#allocation5 + $0xc0] ss:$16 sps:$4 sm:$0xff]   ;;  %v2405_v13 = vld [vmem:[#allocation5 + $0x2c] ss:$16 sps:$4 sm:$0xff]  }
  0x44   :  { %v2336_v25 = vld [vmem:[#allocation5 + $0x2c4] ss:$16 sps:$4 sm:$0xff]   ;;  %v2339_v27 = vld [vmem:[#allocation5 + $0x2c0] ss:$16 sps:$4 sm:$0xff]  }
  0x45   :  { %1253 = vmatpush1.bf16.msra.mxu1 %v2320_v14  ;;  %v2340_v28 = vld [vmem:[#allocation5 + $0xe4] ss:$16 sps:$4 sm:$0xff]   ;;  %v2344_v30 = vld [vmem:[#allocation5 + $0xe0] ss:$16 sps:$4 sm:$0xff]  }
  0x46   :  { %1294 = vmatpush1.bf16.msra.mxu0 %v2321_v15  ;;  %1254 = vmatprep.subr.bf16.mxu1 %v2322_v16  ;;  %v2342_v29 = vld [vmem:[#allocation5 + $0x2e4] ss:$16 sps:$4 sm:$0xff]   ;;  %v2345_v31 = vld [vmem:[#allocation5 + $0x2e0] ss:$16 sps:$4 sm:$0xff]   ;;  %v2403_v15 = vld [vmem:[#allocation5 + $0x28] ss:$16 sps:$4 sm:$0xff]  }
  0x47   :  { %1295 = vmatprep.subr.bf16.mxu0 %v2324_v17  ;;  %v2346_v32 = vld [vmem:[#allocation5 + $0x104] ss:$16 sps:$4 sm:$0xff]   ;;  %v2350_v34 = vld [vmem:[#allocation5 + $0x100] ss:$16 sps:$4 sm:$0xff]   ;;  %v2411_v17 = vld [vmem:[#allocation5 + $0x4c] ss:$16 sps:$4 sm:$0xff]  }
  0x48   :  { %v2348_v33 = vld [vmem:[#allocation5 + $0x304] ss:$16 sps:$4 sm:$0xff]   ;;  %v2351_v35 = vld [vmem:[#allocation5 + $0x300] ss:$16 sps:$4 sm:$0xff]  }
  0x49   :  { %1255 = vmatpush1.bf16.msra.mxu1 %v2326_v18  ;;  %v2352_v36 = vld [vmem:[#allocation5 + $0x124] ss:$16 sps:$4 sm:$0xff]   ;;  %v2356_v38 = vld [vmem:[#allocation5 + $0x120] ss:$16 sps:$4 sm:$0xff]  }
  0x4a   :  { %1296 = vmatpush1.bf16.msra.mxu0 %v2327_v19  ;;  %1256 = vmatprep.subr.bf16.mxu1 %v2328_v20  ;;  %v2354_v37 = vld [vmem:[#allocation5 + $0x324] ss:$16 sps:$4 sm:$0xff]   ;;  %v2357_v39 = vld [vmem:[#allocation5 + $0x320] ss:$16 sps:$4 sm:$0xff]   ;;  %v2409_v19 = vld [vmem:[#allocation5 + $0x48] ss:$16 sps:$4 sm:$0xff]  }
  0x4b   :  { %1297 = vmatprep.subr.bf16.mxu0 %v2330_v21  ;;  %v2358_v40 = vld [vmem:[#allocation5 + $0x144] ss:$16 sps:$4 sm:$0xff]   ;;  %v2362_v42 = vld [vmem:[#allocation5 + $0x140] ss:$16 sps:$4 sm:$0xff]   ;;  %v2417_v21 = vld [vmem:[#allocation5 + $0x6c] ss:$16 sps:$4 sm:$0xff]  }
  0x4c   :  { %v2360_v41 = vld [vmem:[#allocation5 + $0x344] ss:$16 sps:$4 sm:$0xff]   ;;  %v2363_v43 = vld [vmem:[#allocation5 + $0x340] ss:$16 sps:$4 sm:$0xff]  }
  0x4d   :  { %1257 = vmatpush1.bf16.msra.mxu1 %v2332_v22  ;;  %v2364_v44 = vld [vmem:[#allocation5 + $0x164] ss:$16 sps:$4 sm:$0xff]   ;;  %v2368_v47 = vld [vmem:[#allocation5 + $0x160] ss:$16 sps:$4 sm:$0xff]  }
  0x4e   :  { %1298 = vmatpush1.bf16.msra.mxu0 %v2333_v23  ;;  %1258 = vmatprep.subr.bf16.mxu1 %v2334_v24  ;;  %v2366_v45 = vld [vmem:[#allocation5 + $0x364] ss:$16 sps:$4 sm:$0xff]   ;;  %v2369_v50 = vld [vmem:[#allocation5 + $0x360] ss:$16 sps:$4 sm:$0xff]   ;;  %v2415_v23 = vld [vmem:[#allocation5 + $0x68] ss:$16 sps:$4 sm:$0xff]  }
  0x4f   :  { %1299 = vmatprep.subr.bf16.mxu0 %v2336_v25  ;;  %v2370_v51 = vld [vmem:[#allocation5 + $0x184] ss:$16 sps:$4 sm:$0xff]   ;;  %v2374_v54 = vld [vmem:[#allocation5 + $0x180] ss:$16 sps:$4 sm:$0xff]   ;;  %v2423_v25 = vld [vmem:[#allocation5 + $0x8c] ss:$16 sps:$4 sm:$0xff]  }
  0x50   :  { %v2372_v53 = vld [vmem:[#allocation5 + $0x384] ss:$16 sps:$4 sm:$0xff]   ;;  %v2375_v55 = vld [vmem:[#allocation5 + $0x380] ss:$16 sps:$4 sm:$0xff]  }
  0x51   :  { %1259 = vmatpush1.bf16.msra.mxu1 %v2338_v26  ;;  %v2376_v56 = vld [vmem:[#allocation5 + $0x1a4] ss:$16 sps:$4 sm:$0xff]   ;;  %v2380_v58 = vld [vmem:[#allocation5 + $0x1a0] ss:$16 sps:$4 sm:$0xff]  }
  0x52   :  { %1300 = vmatpush1.bf16.msra.mxu0 %v2339_v27  ;;  %1260 = vmatprep.subr.bf16.mxu1 %v2340_v28  ;;  %v2378_v57 = vld [vmem:[#allocation5 + $0x3a4] ss:$16 sps:$4 sm:$0xff]   ;;  %v2381_v59 = vld [vmem:[#allocation5 + $0x3a0] ss:$16 sps:$4 sm:$0xff]   ;;  %v2421_v27 = vld [vmem:[#allocation5 + $0x88] ss:$16 sps:$4 sm:$0xff]  }
  0x53   :  { %1301 = vmatprep.subr.bf16.mxu0 %v2342_v29  ;;  %v2382_v60 = vld [vmem:[#allocation5 + $0x1c4] ss:$16 sps:$4 sm:$0xff]   ;;  %v2386_v62 = vld [vmem:[#allocation5 + $0x1c0] ss:$16 sps:$4 sm:$0xff]   ;;  %v2429_v29 = vld [vmem:[#allocation5 + $0xac] ss:$16 sps:$4 sm:$0xff]  }
  0x54   :  { %v2384_v61 = vld [vmem:[#allocation5 + $0x3c4] ss:$16 sps:$4 sm:$0xff]   ;;  %v2387_v63 = vld [vmem:[#allocation5 + $0x3c0] ss:$16 sps:$4 sm:$0xff]  }
  0x55   :  { %1261 = vmatpush1.bf16.msra.mxu1 %v2344_v30  ;;  %v2388_v0 = vld [vmem:[#allocation5 + $0x1e4] ss:$16 sps:$4 sm:$0xff]   ;;  %v2392_v2 = vld [vmem:[#allocation5 + $0x1e0] ss:$16 sps:$4 sm:$0xff]  }
  0x56   :  { %1302 = vmatpush1.bf16.msra.mxu0 %v2345_v31  ;;  %1262 = vmatprep.subr.bf16.mxu1 %v2346_v32  ;;  %v2390_v1 = vld [vmem:[#allocation5 + $0x3e4] ss:$16 sps:$4 sm:$0xff]   ;;  %v2393_v3 = vld [vmem:[#allocation5 + $0x3e0] ss:$16 sps:$4 sm:$0xff]   ;;  %v2427_v31 = vld [vmem:[#allocation5 + $0xa8] ss:$16 sps:$4 sm:$0xff]  }
  0x57   :  { %1303 = vmatprep.subr.bf16.mxu0 %v2348_v33  ;;  %v60_v4 = vld [vmem:[#allocation2] sm:$0xff]  ;;  %v62_v6 = vld [vmem:[#allocation2 + $0x10] sm:$0xff]  ;;  %v2435_v33 = vld [vmem:[#allocation5 + $0xcc] ss:$16 sps:$4 sm:$0xff]  }
  0x58   :  { %v2396_v5 = vld [vmem:[#allocation5 + $0x404] ss:$16 sps:$4 sm:$0xff]   ;;  %v2857_v8 = vpack.c.bf16 %v60_v4, %v60_v4  ;;  %v2394_v9 = vld [vmem:[#allocation5 + $0x400] ss:$16 sps:$4 sm:$0xff]   ;;  %v2859_v11 = vpack.c.bf16 %v62_v6, %v62_v6  ;;  %v2483_v4 = vld [vmem:[#allocation5 + $0x1cc] ss:$16 sps:$4 sm:$0xff]  }
  0x59   :  { %1263 = vmatpush1.bf16.msra.mxu1 %v2350_v34  ;;  %v2402_v12 = vld [vmem:[#allocation5 + $0x424] ss:$16 sps:$4 sm:$0xff]   ;;  %v2400_v14 = vld [vmem:[#allocation5 + $0x420] ss:$16 sps:$4 sm:$0xff]   ;;  %v65_v34 = vld [vmem:[#allocation2 + $0x28] sm:$0xff] }
  0x5a   :  { %1304 = vmatpush1.bf16.msra.mxu0 %v2351_v35  ;;  %1264 = vmatprep.subr.bf16.mxu1 %v2352_v36  ;;  %v2408_v16 = vld [vmem:[#allocation5 + $0x444] ss:$16 sps:$4 sm:$0xff]   ;;  %v2406_v18 = vld [vmem:[#allocation5 + $0x440] ss:$16 sps:$4 sm:$0xff]   ;;  %v2864_v35 = vpack.c.bf16 %v65_v34, %v65_v34  ;;  %v2481_v6 = vld [vmem:[#allocation5 + $0x1c8] ss:$16 sps:$4 sm:$0xff]  }
  0x5b   :  { %1305 = vmatprep.subr.bf16.mxu0 %v2354_v37  ;;  %v2414_v20 = vld [vmem:[#allocation5 + $0x464] ss:$16 sps:$4 sm:$0xff]   ;;  %v2412_v22 = vld [vmem:[#allocation5 + $0x460] ss:$16 sps:$4 sm:$0xff]   ;;  %v2433_v37 = vld [vmem:[#allocation5 + $0xc8] ss:$16 sps:$4 sm:$0xff]  }
  0x5c   :  { %v2420_v24 = vld [vmem:[#allocation5 + $0x484] ss:$16 sps:$4 sm:$0xff]   ;;  %v2418_v26 = vld [vmem:[#allocation5 + $0x480] ss:$16 sps:$4 sm:$0xff]  }
  0x5d   :  { %1265 = vmatpush1.bf16.msra.mxu1 %v2356_v38  ;;  %v2426_v28 = vld [vmem:[#allocation5 + $0x4a4] ss:$16 sps:$4 sm:$0xff]   ;;  %v2424_v30 = vld [vmem:[#allocation5 + $0x4a0] ss:$16 sps:$4 sm:$0xff]  }
  0x5e   :  { %1306 = vmatpush1.bf16.msra.mxu0 %v2357_v39  ;;  %1266 = vmatprep.subr.bf16.mxu1 %v2358_v40  ;;  %v2432_v32 = vld [vmem:[#allocation5 + $0x4c4] ss:$16 sps:$4 sm:$0xff]   ;;  %v2430_v36 = vld [vmem:[#allocation5 + $0x4c0] ss:$16 sps:$4 sm:$0xff]   ;;  %v2441_v39 = vld [vmem:[#allocation5 + $0xec] ss:$16 sps:$4 sm:$0xff]  }
  0x5f   :  { %1307 = vmatprep.subr.bf16.mxu0 %v2360_v41  ;;  %v2438_v38 = vld [vmem:[#allocation5 + $0x4e4] ss:$16 sps:$4 sm:$0xff]   ;;  %v2436_v40 = vld [vmem:[#allocation5 + $0x4e0] ss:$16 sps:$4 sm:$0xff]   ;;  %v2439_v41 = vld [vmem:[#allocation5 + $0xe8] ss:$16 sps:$4 sm:$0xff]  }
  0x60   :  { %v2450_v46 = vld [vmem:[#allocation5 + $0x524] ss:$16 sps:$4 sm:$0xff]  }
  0x61   :  { %1267 = vmatpush1.bf16.msra.mxu1 %v2362_v42  ;;  %v2444_v42 = vld [vmem:[#allocation5 + $0x504] ss:$16 sps:$4 sm:$0xff]  }
  0x62   :  { %1308 = vmatpush1.bf16.msra.mxu0 %v2363_v43  ;;  %1268 = vmatprep.subr.bf16.mxu1 %v2364_v44  ;;  %v2447_v43 = vld [vmem:[#allocation5 + $0x10c] ss:$16 sps:$4 sm:$0xff]   ;;  %v2442_v44 = vld [vmem:[#allocation5 + $0x500] ss:$16 sps:$4 sm:$0xff]  }
  0x63   :  { %1309 = vmatprep.subr.bf16.mxu0 %v2366_v45  ;;  %v2445_v45 = vld [vmem:[#allocation5 + $0x108] ss:$16 sps:$4 sm:$0xff]   ;;  %v2594_v34 = vld [vmem:[#allocation7 + $0x24] ss:$8 sps:$4 sm:$0xff]  }
  0x65   :  { %1269 = vmatpush1.bf16.msra.mxu1 %v2368_v47  ;;  %v2453_v47 = vld [vmem:[#allocation5 + $0x12c] ss:$16 sps:$4 sm:$0xff]  }
  0x66   :  { %1310 = vmatpush1.bf16.msra.mxu0 %v2369_v50  ;;  %1270 = vmatprep.subr.bf16.mxu1 %v2370_v51  ;;  %v2456_v50 = vld [vmem:[#allocation5 + $0x544] ss:$16 sps:$4 sm:$0xff]   ;;  %v2459_v51 = vld [vmem:[#allocation5 + $0x14c] ss:$16 sps:$4 sm:$0xff]  }
  0x67   :  { %1311 = vmatprep.subr.bf16.mxu0 %v2372_v53  ;;  %v2454_v53 = vld [vmem:[#allocation5 + $0x540] ss:$16 sps:$4 sm:$0xff]  }
  0x69   :  { %1271 = vmatpush1.bf16.msra.mxu1 %v2374_v54  ;;  %v2457_v54 = vld [vmem:[#allocation5 + $0x148] ss:$16 sps:$4 sm:$0xff]  }
  0x6a   :  { %1312 = vmatpush1.bf16.msra.mxu0 %v2375_v55  ;;  %1272 = vmatprep.subr.bf16.mxu1 %v2376_v56  ;;  %v2462_v55 = vld [vmem:[#allocation5 + $0x564] ss:$16 sps:$4 sm:$0xff]   ;;  %v2465_v56 = vld [vmem:[#allocation5 + $0x16c] ss:$16 sps:$4 sm:$0xff]  }
  0x6b   :  { %1313 = vmatprep.subr.bf16.mxu0 %v2378_v57  ;;  %v2460_v57 = vld [vmem:[#allocation5 + $0x560] ss:$16 sps:$4 sm:$0xff]  }
  0x6d   :  { %1273 = vmatpush1.bf16.msra.mxu1 %v2380_v58  ;;  %v2463_v58 = vld [vmem:[#allocation5 + $0x168] ss:$16 sps:$4 sm:$0xff]  }
  0x6e   :  { %1314 = vmatpush1.bf16.msra.mxu0 %v2381_v59  ;;  %1274 = vmatprep.subr.bf16.mxu1 %v2382_v60  ;;  %v2468_v59 = vld [vmem:[#allocation5 + $0x584] ss:$16 sps:$4 sm:$0xff]   ;;  %v2471_v60 = vld [vmem:[#allocation5 + $0x18c] ss:$16 sps:$4 sm:$0xff]  }
  0x6f   :  { %1315 = vmatprep.subr.bf16.mxu0 %v2384_v61  ;;  %v2466_v61 = vld [vmem:[#allocation5 + $0x580] ss:$16 sps:$4 sm:$0xff]  }
  0x71   :  { %1275 = vmatpush1.bf16.msra.mxu1 %v2386_v62  ;;  %v2469_v62 = vld [vmem:[#allocation5 + $0x188] ss:$16 sps:$4 sm:$0xff]  }
  0x72   :  { %1316 = vmatpush1.bf16.msra.mxu0 %v2387_v63  ;;  %1276 = vmatprep.subr.bf16.mxu1 %v2388_v0  ;;  %v2474_v63 = vld [vmem:[#allocation5 + $0x5a4] ss:$16 sps:$4 sm:$0xff]   ;;  %v2477_v0 = vld [vmem:[#allocation5 + $0x1ac] ss:$16 sps:$4 sm:$0xff]  }
  0x73   :  { %1317 = vmatprep.subr.bf16.mxu0 %v2390_v1  ;;  %v2472_v1 = vld [vmem:[#allocation5 + $0x5a0] ss:$16 sps:$4 sm:$0xff]  }
  0x75   :  { %1277 = vmatpush1.bf16.msra.mxu1 %v2392_v2  ;;  %v2475_v2 = vld [vmem:[#allocation5 + $0x1a8] ss:$16 sps:$4 sm:$0xff]  }
  0x76   :  { %1318 = vmatpush1.bf16.msra.mxu0 %v2393_v3  ;;  %1369 = vmatprep.subr.bf16.mxu1 %v2399_v7  ;;  %v2480_v3 = vld [vmem:[#allocation5 + $0x5c4] ss:$16 sps:$4 sm:$0xff]  }
  0x77   :  { %1328 = vmatprep.subr.bf16.mxu0 %v2396_v5  ;;  %v2478_v5 = vld [vmem:[#allocation5 + $0x5c0] ss:$16 sps:$4 sm:$0xff]   ;;  %v2486_v7 = vld [vmem:[#allocation5 + $0x5e4] ss:$16 sps:$4 sm:$0xff]  }
  0x78   :  { %1279 = vmatmul.mubr.bf16.vlgmr.msra.gmra.mrb[0].mxu1 %v2857_v8 }
  0x79   :  { %1320 = vmatmul.mubr.bf16.vlgmr.msra.gmra.mrb[0].mxu0 %v2859_v11  ;;  %1370 = vmatpush1.bf16.msra.mxu1 %v2397_v10  ;;  %v2484_v10 = vld [vmem:[#allocation5 + $0x5e0] ss:$16 sps:$4 sm:$0xff]  }
  0x7a   :  { %1329 = vmatpush1.bf16.msra.mxu0 %v2394_v9  ;;  %1371 = vmatprep.subr.bf16.mxu1 %v2405_v13  ;;  %v2489_v9 = vld [vmem:[#allocation5 + $0x1ec] ss:$16 sps:$4 sm:$0xff]   ;;  %v64_v13 = vld [vmem:[#allocation2 + $0x20] sm:$0xff] }
  0x7b   :  { %1330 = vmatprep.subr.bf16.mxu0 %v2402_v12  ;;  %1401 = vmatprep.mubr.bf16.mxu1 %v2851_v48  ;;  %v2448_v48 = vld [vmem:[#allocation5 + $0x520] ss:$16 sps:$4 sm:$0xff]   ;;  %v2487_v12 = vld [vmem:[#allocation5 + $0x1e8] ss:$16 sps:$4 sm:$0xff]  }
  0x7c   :  { %1360 = vmatprep.mubr.bf16.mxu0 %v2864_v35 }
  0x7d   :  { %1372 = vmatpush1.bf16.msra.mxu1 %v2403_v15  ;;  %v2867_v15 = vpack.c.bf16 %v64_v13, %v64_v13  ;;  %v2619_v13 = vld [vmem:[#allocation7 + $0xb0] ss:$8 sps:$4 sm:$0xff]  }
  0x7e   :  { %1331 = vmatpush1.bf16.msra.mxu0 %v2400_v14  ;;  %1373 = vmatprep.subr.bf16.mxu1 %v2411_v17  ;;  %v2492_v14 = vld [vmem:[#allocation5 + $0x20c] ss:$16 sps:$4 sm:$0xff]  }
  0x7f   :  { %1332 = vmatprep.subr.bf16.mxu0 %v2408_v16  ;;  %v2490_v16 = vld [vmem:[#allocation5 + $0x208] ss:$16 sps:$4 sm:$0xff]   ;;  %v2495_v17 = vld [vmem:[#allocation5 + $0x22c] ss:$16 sps:$4 sm:$0xff]  }
  0x81   :  { %1374 = vmatpush1.bf16.msra.mxu1 %v2409_v19  ;;  %v2498_v19 = vld [vmem:[#allocation5 + $0x24c] ss:$16 sps:$4 sm:$0xff]  }
  0x82   :  { %1333 = vmatpush1.bf16.msra.mxu0 %v2406_v18  ;;  %1375 = vmatprep.subr.bf16.mxu1 %v2417_v21  ;;  %v2493_v18 = vld [vmem:[#allocation5 + $0x228] ss:$16 sps:$4 sm:$0xff]   ;;  %v2501_v21 = vld [vmem:[#allocation5 + $0x26c] ss:$16 sps:$4 sm:$0xff]  }
  0x83   :  { %1334 = vmatprep.subr.bf16.mxu0 %v2414_v20  ;;  %v2496_v20 = vld [vmem:[#allocation5 + $0x248] ss:$16 sps:$4 sm:$0xff]  }
  0x85   :  { %1376 = vmatpush1.bf16.msra.mxu1 %v2415_v23  ;;  %v2504_v23 = vld [vmem:[#allocation5 + $0x28c] ss:$16 sps:$4 sm:$0xff]  }
  0x86   :  { %1335 = vmatpush1.bf16.msra.mxu0 %v2412_v22  ;;  %1377 = vmatprep.subr.bf16.mxu1 %v2423_v25  ;;  %v2499_v22 = vld [vmem:[#allocation5 + $0x268] ss:$16 sps:$4 sm:$0xff]   ;;  %v2507_v25 = vld [vmem:[#allocation5 + $0x2ac] ss:$16 sps:$4 sm:$0xff]  }
  0x87   :  { %1336 = vmatprep.subr.bf16.mxu0 %v2420_v24  ;;  %v2502_v24 = vld [vmem:[#allocation5 + $0x288] ss:$16 sps:$4 sm:$0xff]  }
  0x89   :  { %1378 = vmatpush1.bf16.msra.mxu1 %v2421_v27  ;;  %v2510_v27 = vld [vmem:[#allocation5 + $0x2cc] ss:$16 sps:$4 sm:$0xff]  }
  0x8a   :  { %1337 = vmatpush1.bf16.msra.mxu0 %v2418_v26  ;;  %1379 = vmatprep.subr.bf16.mxu1 %v2429_v29  ;;  %v2505_v26 = vld [vmem:[#allocation5 + $0x2a8] ss:$16 sps:$4 sm:$0xff]   ;;  %v2588_v29 = vld [vmem:[#allocation7 + $0x4] ss:$8 sps:$4 sm:$0xff]  }
  0x8b   :  { %1338 = vmatprep.subr.bf16.mxu0 %v2426_v28  ;;  %v2586_v28 = vld [vmem:[#allocation7] ss:$8 sps:$4 sm:$0xff]  }
  0x8d   :  { %1380 = vmatpush1.bf16.msra.mxu1 %v2427_v31  ;;  %v2511_v31 = vld [vmem:[#allocation5 + $0x2e8] ss:$16 sps:$4 sm:$0xff]  }
  0x8e   :  { %1339 = vmatpush1.bf16.msra.mxu0 %v2424_v30  ;;  %1381 = vmatprep.subr.bf16.mxu1 %v2435_v33  ;;  %v2591_v30 = vld [vmem:[#allocation7 + $0x14] ss:$8 sps:$4 sm:$0xff]  }
  0x8f   :  { %1340 = vmatprep.subr.bf16.mxu0 %v2432_v32  ;;  %v2589_v32 = vld [vmem:[#allocation7 + $0x10] ss:$8 sps:$4 sm:$0xff]   ;;  %v2516_v33 = vld [vmem:[#allocation5 + $0x30c] ss:$16 sps:$4 sm:$0xff]  }
  0x91   :  { %1382 = vmatpush1.bf16.msra.mxu1 %v2433_v37  ;;  %v2592_v37 = vld [vmem:[#allocation7 + $0x20] ss:$8 sps:$4 sm:$0xff]  }
  0x92   :  { %1341 = vmatpush1.bf16.msra.mxu0 %v2430_v36  ;;  %1383 = vmatprep.subr.bf16.mxu1 %v2441_v39  ;;  %v2514_v36 = vld [vmem:[#allocation5 + $0x308] ss:$16 sps:$4 sm:$0xff]   ;;  %v2597_v39 = vld [vmem:[#allocation7 + $0x34] ss:$8 sps:$4 sm:$0xff]  }
  0x93   :  { %1342 = vmatprep.subr.bf16.mxu0 %v2438_v38  ;;  %v2519_v38 = vld [vmem:[#allocation5 + $0x32c] ss:$16 sps:$4 sm:$0xff]  }
  0x95   :  { %1384 = vmatpush1.bf16.msra.mxu1 %v2439_v41  ;;  %v2595_v41 = vld [vmem:[#allocation7 + $0x30] ss:$8 sps:$4 sm:$0xff]  }
  0x96   :  { %1343 = vmatpush1.bf16.msra.mxu0 %v2436_v40  ;;  %1385 = vmatprep.subr.bf16.mxu1 %v2447_v43  ;;  %v2517_v40 = vld [vmem:[#allocation5 + $0x328] ss:$16 sps:$4 sm:$0xff]   ;;  %v2600_v43 = vld [vmem:[#allocation7 + $0x44] ss:$8 sps:$4 sm:$0xff]  }
  0x97   :  { %1344 = vmatprep.subr.bf16.mxu0 %v2444_v42  ;;  %v2522_v42 = vld [vmem:[#allocation5 + $0x34c] ss:$16 sps:$4 sm:$0xff]  }
  0x99   :  { %1386 = vmatpush1.bf16.msra.mxu1 %v2445_v45  ;;  %v2598_v45 = vld [vmem:[#allocation7 + $0x40] ss:$8 sps:$4 sm:$0xff]  }
  0x9a   :  { %1345 = vmatpush1.bf16.msra.mxu0 %v2442_v44  ;;  %1387 = vmatprep.subr.bf16.mxu1 %v2453_v47  ;;  %v2520_v44 = vld [vmem:[#allocation5 + $0x348] ss:$16 sps:$4 sm:$0xff]   ;;  %v2603_v47 = vld [vmem:[#allocation7 + $0x54] ss:$8 sps:$4 sm:$0xff]  }
  0x9b   :  { %1346 = vmatprep.subr.bf16.mxu0 %v2450_v46  ;;  %v2525_v46 = vld [vmem:[#allocation5 + $0x36c] ss:$16 sps:$4 sm:$0xff]  }
  0x9d   :  { %1388 = vmatpush1.bf16.msra.mxu1 %v2451_v49  ;;  %v2601_v49 = vld [vmem:[#allocation7 + $0x50] ss:$8 sps:$4 sm:$0xff]  }
  0x9e   :  { %1347 = vmatpush1.bf16.msra.mxu0 %v2448_v48  ;;  %1389 = vmatprep.subr.bf16.mxu1 %v2459_v51  ;;  %v2523_v48 = vld [vmem:[#allocation5 + $0x368] ss:$16 sps:$4 sm:$0xff]   ;;  %v2606_v51 = vld [vmem:[#allocation7 + $0x64] ss:$8 sps:$4 sm:$0xff]  }
  0x9f   :  { %1348 = vmatprep.subr.bf16.mxu0 %v2456_v50  ;;  %v2528_v50 = vld [vmem:[#allocation5 + $0x38c] ss:$16 sps:$4 sm:$0xff]  }
  0xa1   :  { %1390 = vmatpush1.bf16.msra.mxu1 %v2457_v54  ;;  %v2604_v54 = vld [vmem:[#allocation7 + $0x60] ss:$8 sps:$4 sm:$0xff]  }
  0xa2   :  { %1349 = vmatpush1.bf16.msra.mxu0 %v2454_v53  ;;  %1391 = vmatprep.subr.bf16.mxu1 %v2465_v56  ;;  %v2526_v53 = vld [vmem:[#allocation5 + $0x388] ss:$16 sps:$4 sm:$0xff]   ;;  %v2609_v56 = vld [vmem:[#allocation7 + $0x74] ss:$8 sps:$4 sm:$0xff]  }
  0xa3   :  { %1350 = vmatprep.subr.bf16.mxu0 %v2462_v55  ;;  %v2531_v55 = vld [vmem:[#allocation5 + $0x3ac] ss:$16 sps:$4 sm:$0xff]  }
  0xa5   :  { %1392 = vmatpush1.bf16.msra.mxu1 %v2463_v58  ;;  %v2607_v58 = vld [vmem:[#allocation7 + $0x70] ss:$8 sps:$4 sm:$0xff]  }
  0xa6   :  { %1351 = vmatpush1.bf16.msra.mxu0 %v2460_v57  ;;  %1393 = vmatprep.subr.bf16.mxu1 %v2471_v60  ;;  %v2529_v57 = vld [vmem:[#allocation5 + $0x3a8] ss:$16 sps:$4 sm:$0xff]   ;;  %v2612_v60 = vld [vmem:[#allocation7 + $0x84] ss:$8 sps:$4 sm:$0xff]  }
  0xa7   :  { %1352 = vmatprep.subr.bf16.mxu0 %v2468_v59  ;;  %v2534_v59 = vld [vmem:[#allocation5 + $0x3cc] ss:$16 sps:$4 sm:$0xff]  }
  0xa9   :  { %1394 = vmatpush1.bf16.msra.mxu1 %v2469_v62  ;;  %v2610_v62 = vld [vmem:[#allocation7 + $0x80] ss:$8 sps:$4 sm:$0xff]  }
  0xaa   :  { %1353 = vmatpush1.bf16.msra.mxu0 %v2466_v61  ;;  %1395 = vmatprep.subr.bf16.mxu1 %v2477_v0  ;;  %v2532_v61 = vld [vmem:[#allocation5 + $0x3c8] ss:$16 sps:$4 sm:$0xff]   ;;  %v2615_v0 = vld [vmem:[#allocation7 + $0x94] ss:$8 sps:$4 sm:$0xff]  }
  0xab   :  { %1354 = vmatprep.subr.bf16.mxu0 %v2474_v63  ;;  %v2537_v63 = vld [vmem:[#allocation5 + $0x3ec] ss:$16 sps:$4 sm:$0xff]  }
  0xad   :  { %1396 = vmatpush1.bf16.msra.mxu1 %v2475_v2  ;;  %v2613_v2 = vld [vmem:[#allocation7 + $0x90] ss:$8 sps:$4 sm:$0xff]  }
  0xae   :  { %1355 = vmatpush1.bf16.msra.mxu0 %v2472_v1  ;;  %1397 = vmatprep.subr.bf16.mxu1 %v2483_v4  ;;  %v2535_v1 = vld [vmem:[#allocation5 + $0x3e8] ss:$16 sps:$4 sm:$0xff]   ;;  %v2618_v4 = vld [vmem:[#allocation7 + $0xa4] ss:$8 sps:$4 sm:$0xff]  }
  0xaf   :  { %1356 = vmatprep.subr.bf16.mxu0 %v2480_v3  ;;  %v2540_v3 = vld [vmem:[#allocation5 + $0x40c] ss:$16 sps:$4 sm:$0xff]  }
  0xb1   :  { %1398 = vmatpush1.bf16.msra.mxu1 %v2481_v6  ;;  %v2543_v6 = vld [vmem:[#allocation5 + $0x42c] ss:$16 sps:$4 sm:$0xff]  }
  0xb2   :  { %1357 = vmatpush1.bf16.msra.mxu0 %v2478_v5  ;;  %1399 = vmatprep.subr.bf16.mxu1 %v2489_v9  ;;  %v2538_v5 = vld [vmem:[#allocation5 + $0x408] ss:$16 sps:$4 sm:$0xff]   ;;  %v2621_v9 = vld [vmem:[#allocation7 + $0xb4] ss:$8 sps:$4 sm:$0xff]  }
  0xb3   :  { %1358 = vmatprep.subr.bf16.mxu0 %v2486_v7  ;;  %v2616_v7 = vld [vmem:[#allocation7 + $0xa0] ss:$8 sps:$4 sm:$0xff]  }
  0xb5   :  { %1400 = vmatpush1.bf16.msra.mxu1 %v2487_v12  ;;  %v2546_v12 = vld [vmem:[#allocation5 + $0x44c] ss:$16 sps:$4 sm:$0xff]  }
  0xb6   :  { %1359 = vmatpush1.bf16.msra.mxu0 %v2484_v10  ;;  %1410 = vmatprep.subr.bf16.mxu1 %v2492_v14  ;;  %v2541_v10 = vld [vmem:[#allocation5 + $0x428] ss:$16 sps:$4 sm:$0xff]   ;;  %v2624_v14 = vld [vmem:[#allocation7 + $0xc4] ss:$8 sps:$4 sm:$0xff]  }
  0xb7   :  { %1896 = vmatprep.subr.bf16.mxu0 %v2588_v29  ;;  %v2559_v29 = vld [vmem:[#allocation5 + $0x4e8] ss:$16 sps:$4 sm:$0xff]  }
  0xb8   :  { %1402 = vmatmul.mubr.bf16.vlgmr.msra.gmra.mrb[4].mxu1 %v2857_v8  ;;  %v2508_v8 = vld [vmem:[#allocation5 + $0x2c8] ss:$16 sps:$4 sm:$0xff]  }
  0xb9   :  { %1361 = vmatmul.mubr.bf16.vlgmr.msra.gmra.mrb[0].mxu0 %v2867_v15  ;;  %1411 = vmatpush1.bf16.msra.mxu1 %v2490_v16  ;;  %v2544_v16 = vld [vmem:[#allocation5 + $0x448] ss:$16 sps:$4 sm:$0xff]  }
  0xba   :  { %1442 = vmatprep.mubr.bf16.mxu1 %v2853_v52  ;;  %1412 = vmatprep.subr.bf16.mxu1 %v2495_v17  ;;  %v2513_v52 = vld [vmem:[#allocation5 + $0x2ec] ss:$16 sps:$4 sm:$0xff]  }
  0xbb   :  { %1897 = vmatpush1.bf16.msra.mxu0 %v2586_v28  ;;  %v2549_v17 = vld [vmem:[#allocation5 + $0x46c] ss:$16 sps:$4 sm:$0xff]   ;;  %v2631_v28 = vld [vmem:[#allocation7 + $0xf0] ss:$8 sps:$4 sm:$0xff]  }
  0xbc   :  { %1898 = vmatprep.subr.bf16.mxu0 %v2591_v30  ;;  %v2564_v30 = vld [vmem:[#allocation5 + $0x50c] ss:$16 sps:$4 sm:$0xff]  }
  0xbd   :  { %1413 = vmatpush1.bf16.msra.mxu1 %v2493_v18  ;;  %v2622_v18 = vld [vmem:[#allocation7 + $0xc0] ss:$8 sps:$4 sm:$0xff]  }
  0xbe   :  { %1414 = vmatprep.subr.bf16.mxu1 %v2498_v19  ;;  %v2627_v19 = vld [vmem:[#allocation7 + $0xd4] ss:$8 sps:$4 sm:$0xff]  }
  0xbf   :  { %1899 = vmatpush1.bf16.msra.mxu0 %v2589_v32  ;;  %v2562_v32 = vld [vmem:[#allocation5 + $0x508] ss:$16 sps:$4 sm:$0xff]  }
  0xc0   :  { %1900 = vmatprep.subr.bf16.mxu0 %v2594_v34  ;;  %v2565_v34 = vld [vmem:[#allocation5 + $0x528] ss:$16 sps:$4 sm:$0xff]  }
  0xc1   :  { %1415 = vmatpush1.bf16.msra.mxu1 %v2496_v20  ;;  %v2552_v20 = vld [vmem:[#allocation5 + $0x48c] ss:$16 sps:$4 sm:$0xff]  }
  0xc2   :  { %1416 = vmatprep.subr.bf16.mxu1 %v2501_v21  ;;  %v2550_v21 = vld [vmem:[#allocation5 + $0x488] ss:$16 sps:$4 sm:$0xff]  }
  0xc3   :  { %1901 = vmatpush1.bf16.msra.mxu0 %v2592_v37  ;;  %v2568_v37 = vld [vmem:[#allocation5 + $0x548] ss:$16 sps:$4 sm:$0xff]  }
  0xc4   :  { %1902 = vmatprep.subr.bf16.mxu0 %v2597_v39  ;;  %v2571_v39 = vld [vmem:[#allocation5 + $0x568] ss:$16 sps:$4 sm:$0xff]  }
  0xc5   :  { %1417 = vmatpush1.bf16.msra.mxu1 %v2499_v22  ;;  %v2555_v22 = vld [vmem:[#allocation5 + $0x4ac] ss:$16 sps:$4 sm:$0xff]  }
  0xc6   :  { %1418 = vmatprep.subr.bf16.mxu1 %v2504_v23  ;;  %v2553_v23 = vld [vmem:[#allocation5 + $0x4a8] ss:$16 sps:$4 sm:$0xff]  }
  0xc7   :  { %1903 = vmatpush1.bf16.msra.mxu0 %v2595_v41  ;;  %v2574_v41 = vld [vmem:[#allocation5 + $0x588] ss:$16 sps:$4 sm:$0xff]  }
  0xc8   :  { %1904 = vmatprep.subr.bf16.mxu0 %v2600_v43  ;;  %v2577_v43 = vld [vmem:[#allocation5 + $0x5a8] ss:$16 sps:$4 sm:$0xff]  }
  0xc9   :  { %1419 = vmatpush1.bf16.msra.mxu1 %v2502_v24  ;;  %v2558_v24 = vld [vmem:[#allocation5 + $0x4cc] ss:$16 sps:$4 sm:$0xff]  }
  0xca   :  { %1420 = vmatprep.subr.bf16.mxu1 %v2507_v25  ;;  %v2630_v25 = vld [vmem:[#allocation7 + $0xe4] ss:$8 sps:$4 sm:$0xff]  }
  0xcb   :  { %1905 = vmatpush1.bf16.msra.mxu0 %v2598_v45  ;;  %v2580_v45 = vld [vmem:[#allocation5 + $0x5c8] ss:$16 sps:$4 sm:$0xff]  }
  0xcc   :  { %1906 = vmatprep.subr.bf16.mxu0 %v2603_v47  ;;  %v2583_v47 = vld [vmem:[#allocation5 + $0x5e8] ss:$16 sps:$4 sm:$0xff]  }
  0xcd   :  { %1421 = vmatpush1.bf16.msra.mxu1 %v2505_v26  ;;  %v2628_v26 = vld [vmem:[#allocation7 + $0xe0] ss:$8 sps:$4 sm:$0xff]  }
  0xce   :  { %1422 = vmatprep.subr.bf16.mxu1 %v2510_v27  ;;  %v2556_v27 = vld [vmem:[#allocation5 + $0x4c8] ss:$16 sps:$4 sm:$0xff]  }
  0xcf   :  { %1907 = vmatpush1.bf16.msra.mxu0 %v2601_v49 }
  0xd0   :  { %1908 = vmatprep.subr.bf16.mxu0 %v2606_v51 }
  0xd1   :  { %1423 = vmatpush1.bf16.msra.mxu1 %v2508_v8  ;;  %v2561_v8 = vld [vmem:[#allocation5 + $0x4ec] ss:$16 sps:$4 sm:$0xff]  }
  0xd2   :  { %1424 = vmatprep.subr.bf16.mxu1 %v2513_v52  ;;  %v2633_v52 = vld [vmem:[#allocation7 + $0xf4] ss:$8 sps:$4 sm:$0xff]  }
  0xd3   :  { %1909 = vmatpush1.bf16.msra.mxu0 %v2604_v54 }
  0xd4   :  { %1910 = vmatprep.subr.bf16.mxu0 %v2609_v56  ;;  %v2881_v56 = vld [vmem:[%s2915_s2] sm:$0xf] }
  0xd5   :  { %1425 = vmatpush1.bf16.msra.mxu1 %v2511_v31  ;;  %v2636_v31 = vld [vmem:[#allocation7 + $0x104] ss:$8 sps:$4 sm:$0xff]  }
  0xd6   :  { %1426 = vmatprep.subr.bf16.mxu1 %v2516_v33  ;;  %v2567_v33 = vld [vmem:[#allocation5 + $0x52c] ss:$16 sps:$4 sm:$0xff]  }
  0xd7   :  { %1911 = vmatpush1.bf16.msra.mxu0 %v2607_v58 }
  0xd8   :  { %1912 = vmatprep.subr.bf16.mxu0 %v2612_v60 }
  0xd9   :  { %1427 = vmatpush1.bf16.msra.mxu1 %v2514_v36  ;;  %v2570_v36 = vld [vmem:[#allocation5 + $0x54c] ss:$16 sps:$4 sm:$0xff]  }
  0xda   :  { %1428 = vmatprep.subr.bf16.mxu1 %v2519_v38  ;;  %v2573_v38 = vld [vmem:[#allocation5 + $0x56c] ss:$16 sps:$4 sm:$0xff]  }
  0xdb   :  { %1913 = vmatpush1.bf16.msra.mxu0 %v2610_v62 }
  0xdc   :  { %1914 = vmatprep.subr.bf16.mxu0 %v2615_v0 }
  0xdd   :  { %1429 = vmatpush1.bf16.msra.mxu1 %v2517_v40  ;;  %v2576_v40 = vld [vmem:[#allocation5 + $0x58c] ss:$16 sps:$4 sm:$0xff]  }
  0xde   :  { %1430 = vmatprep.subr.bf16.mxu1 %v2522_v42  ;;  %v2579_v42 = vld [vmem:[#allocation5 + $0x5ac] ss:$16 sps:$4 sm:$0xff]  }
  0xdf   :  { %1915 = vmatpush1.bf16.msra.mxu0 %v2613_v2 }
  0xe0   :  { %1916 = vmatprep.subr.bf16.mxu0 %v2618_v4 }
  0xe1   :  { %1431 = vmatpush1.bf16.msra.mxu1 %v2520_v44  ;;  %v2582_v44 = vld [vmem:[#allocation5 + $0x5cc] ss:$16 sps:$4 sm:$0xff]  }
  0xe2   :  { %1432 = vmatprep.subr.bf16.mxu1 %v2525_v46  ;;  %v2585_v46 = vld [vmem:[#allocation5 + $0x5ec] ss:$16 sps:$4 sm:$0xff]  }
  0xe3   :  { %1917 = vmatpush1.bf16.msra.mxu0 %v2616_v7 }
  0xe4   :  { %1918 = vmatprep.subr.bf16.mxu0 %v2621_v9  ;;  %v2639_v9 = vld [vmem:[#allocation7 + $0x114] ss:$8 sps:$4 sm:$0xff]  }
  0xe5   :  { %1433 = vmatpush1.bf16.msra.mxu1 %v2523_v48 }
  0xe6   :  { %1434 = vmatprep.subr.bf16.mxu1 %v2528_v50 }
  0xe7   :  { %1919 = vmatpush1.bf16.msra.mxu0 %v2619_v13  ;;  %v2640_v13 = vld [vmem:[#allocation7 + $0x120] ss:$8 sps:$4 sm:$0xff]  }
  0xe8   :  { %1920 = vmatprep.subr.bf16.mxu0 %v2624_v14  ;;  %v2645_v14 = vld [vmem:[#allocation7 + $0x134] ss:$8 sps:$4 sm:$0xff]  }
  0xe9   :  { %1435 = vmatpush1.bf16.msra.mxu1 %v2526_v53  ;;  %v266_v53 = vlaneseq }
  0xea   :  { %1436 = vmatprep.subr.bf16.mxu1 %v2531_v55 }
  0xeb   :  { %1921 = vmatpush1.bf16.msra.mxu0 %v2622_v18  ;;  %v2875_v54 = vshrl.u32 %v266_v53, 7  ;;  %v2646_v18 = vld [vmem:[#allocation7 + $0x140] ss:$8 sps:$4 sm:$0xff]   ;;  %v1564_v53 = vld [vmem:[%s2917_s4] sm:$0x3]  ;;  %s2748_s4 = scalar_lea.vmem %s1998_s9, 128 }
  0xec   :  { %1922 = vmatprep.subr.bf16.mxu0 %v2627_v19  ;;  %v2651_v19 = vld [vmem:[#allocation7 + $0x154] ss:$8 sps:$4 sm:$0xff]   ;;  %p2749_p10 = scmp.ne.s32.totalorder %s1998_s9, %s2748_s4  ;;  %p2754_p12 = scmp.lt.s32.totalorder %s2748_s4, %s2748_s4 }
  0xed   :  { %1437 = vmatpush1.bf16.msra.mxu1 %v2529_v57  ;;  %v268_v55 = vsub.s32 0, %v2875_v54  ;;  %v272_v57 = vsub.s32 1, %v2875_v54 }
  0xee   :  { %1438 = vmatprep.subr.bf16.mxu1 %v2534_v59  ;;  %p2755_p13 = por %p2754_p12, %p2753_p11 }
  0xef   :  { %v273_v58 = vrot.slane %v2881_v56, %v272_v57 }
  0xf0   :  { %p2756_p0 = pnand %p2755_p13, %p2749_p10 }
  0xf1   :  { %1439 = vmatpush1.bf16.msra.mxu1 %v2532_v61 }
  0xf2   :  { %1440 = vmatprep.subr.bf16.mxu1 %v2537_v63 }
  0xf5   :  { %1441 = vmatpush1.bf16.msra.mxu1 %v2535_v1 }
  0xf6   :  { %1451 = vmatprep.subr.bf16.mxu1 %v2540_v3 }
  0xf8   :  { %1443 = vmatmul.mubr.bf16.vlgmr.msra.gmra.mrb[4].mxu1 %v2859_v11  ;;  %v2547_v11 = vld [vmem:[#allocation5 + $0x468] ss:$16 sps:$4 sm:$0xff]  }
  0xf9   :  { %1452 = vmatpush1.bf16.msra.mxu1 %v2538_v5  ;;  %1483 = vmatprep.mubr.bf16.mxu1 %v2864_v35  ;;  %v2625_v35 = vld [vmem:[#allocation7 + $0xd0] ss:$8 sps:$4 sm:$0xff]  }
  0xfa   :  { %1453 = vmatprep.subr.bf16.mxu1 %v2543_v6  ;;  %1923 = vmatpush1.bf16.msra.mxu0 %v2625_v35  ;;  %v2634_v6 = vld [vmem:[#allocation7 + $0x100] ss:$8 sps:$4 sm:$0xff]  }
  0xfb   :  { %1924 = vmatprep.subr.bf16.mxu0 %v2630_v25  ;;  %v2652_v35 = vld [vmem:[#allocation7 + $0x160] ss:$8 sps:$4 sm:$0xff]   ;;  %v2663_v25 = vld [vmem:[#allocation7 + $0x194] ss:$8 sps:$4 sm:$0xff]  }
  0xfd   :  { %1454 = vmatpush1.bf16.msra.mxu1 %v2541_v10  ;;  %v2637_v10 = vld [vmem:[#allocation7 + $0x110] ss:$8 sps:$4 sm:$0xff]  }
  0xfe   :  { %1455 = vmatprep.subr.bf16.mxu1 %v2546_v12  ;;  %1925 = vmatpush1.bf16.msra.mxu0 %v2628_v26  ;;  %v2642_v12 = vld [vmem:[#allocation7 + $0x124] ss:$8 sps:$4 sm:$0xff]   ;;  %v2661_v26 = vld [vmem:[#allocation7 + $0x190] ss:$8 sps:$4 sm:$0xff]  }
  0xff   :  { %1926 = vmatprep.subr.bf16.mxu0 %v2633_v52  ;;  %v2669_v52 = vld [vmem:[#allocation7 + $0x1b4] ss:$8 sps:$4 sm:$0xff]  }
 0x101   :  { %1456 = vmatpush1.bf16.msra.mxu1 %v2544_v16  ;;  %v2643_v16 = vld [vmem:[#allocation7 + $0x130] ss:$8 sps:$4 sm:$0xff]  }
 0x102   :  { %1457 = vmatprep.subr.bf16.mxu1 %v2549_v17  ;;  %1927 = vmatpush1.bf16.msra.mxu0 %v2631_v28  ;;  %v2648_v17 = vld [vmem:[#allocation7 + $0x144] ss:$8 sps:$4 sm:$0xff]   ;;  %v2667_v28 = vld [vmem:[#allocation7 + $0x1b0] ss:$8 sps:$4 sm:$0xff]  }
 0x103   :  { %1937 = vmatprep.subr.bf16.mxu0 %v2636_v31  ;;  %v2675_v31 = vld [vmem:[#allocation7 + $0x1d4] ss:$8 sps:$4 sm:$0xff]  }
 0x105   :  { %1458 = vmatpush1.bf16.msra.mxu1 %v2547_v11  ;;  %v2649_v11 = vld [vmem:[#allocation7 + $0x150] ss:$8 sps:$4 sm:$0xff]  }
 0x106   :  { %1459 = vmatprep.subr.bf16.mxu1 %v2552_v20  ;;  %v2654_v20 = vld [vmem:[#allocation7 + $0x164] ss:$8 sps:$4 sm:$0xff]  }
 0x109   :  { %1460 = vmatpush1.bf16.msra.mxu1 %v2550_v21  ;;  %v2657_v21 = vld [vmem:[#allocation7 + $0x174] ss:$8 sps:$4 sm:$0xff]  }
 0x10a   :  { %1461 = vmatprep.subr.bf16.mxu1 %v2555_v22  ;;  %v2655_v22 = vld [vmem:[#allocation7 + $0x170] ss:$8 sps:$4 sm:$0xff]  }
 0x10d   :  { %1462 = vmatpush1.bf16.msra.mxu1 %v2553_v23  ;;  %v2660_v23 = vld [vmem:[#allocation7 + $0x184] ss:$8 sps:$4 sm:$0xff]  }
 0x10e   :  { %1463 = vmatprep.subr.bf16.mxu1 %v2558_v24  ;;  %v2658_v24 = vld [vmem:[#allocation7 + $0x180] ss:$8 sps:$4 sm:$0xff]  }
 0x111   :  { %1464 = vmatpush1.bf16.msra.mxu1 %v2556_v27  ;;  %v2666_v27 = vld [vmem:[#allocation7 + $0x1a4] ss:$8 sps:$4 sm:$0xff]  }
 0x112   :  { %1465 = vmatprep.subr.bf16.mxu1 %v2561_v8  ;;  %v2664_v8 = vld [vmem:[#allocation7 + $0x1a0] ss:$8 sps:$4 sm:$0xff]  }
 0x115   :  { %1466 = vmatpush1.bf16.msra.mxu1 %v2559_v29  ;;  %v2672_v29 = vld [vmem:[#allocation7 + $0x1c4] ss:$8 sps:$4 sm:$0xff]  }
 0x116   :  { %1467 = vmatprep.subr.bf16.mxu1 %v2564_v30  ;;  %v2670_v30 = vld [vmem:[#allocation7 + $0x1c0] ss:$8 sps:$4 sm:$0xff]  }
 0x119   :  { %1468 = vmatpush1.bf16.msra.mxu1 %v2562_v32  ;;  %v2673_v32 = vld [vmem:[#allocation7 + $0x1d0] ss:$8 sps:$4 sm:$0xff]  }
 0x11a   :  { %1469 = vmatprep.subr.bf16.mxu1 %v2567_v33  ;;  %v2678_v33 = vld [vmem:[#allocation7 + $0x1e4] ss:$8 sps:$4 sm:$0xff]  }
 0x11d   :  { %1470 = vmatpush1.bf16.msra.mxu1 %v2565_v34  ;;  %v2676_v34 = vld [vmem:[#allocation7 + $0x1e0] ss:$8 sps:$4 sm:$0xff]  }
 0x11e   :  { %1471 = vmatprep.subr.bf16.mxu1 %v2570_v36  ;;  %v2681_v36 = vld [vmem:[#allocation7 + $0x1f4] ss:$8 sps:$4 sm:$0xff]  }
 0x121   :  { %1472 = vmatpush1.bf16.msra.mxu1 %v2568_v37  ;;  %v2679_v37 = vld [vmem:[#allocation7 + $0x1f0] ss:$8 sps:$4 sm:$0xff]  }
 0x122   :  { %1473 = vmatprep.subr.bf16.mxu1 %v2573_v38  ;;  %v276_v38 = vsub.s32 2, %v2875_v54 }
 0x125   :  { %1474 = vmatpush1.bf16.msra.mxu1 %v2571_v39  ;;  %v280_v39 = vsub.s32 3, %v2875_v54 }
 0x126   :  { %1475 = vmatprep.subr.bf16.mxu1 %v2576_v40  ;;  %v277_v40 = vrot.slane %v2881_v56, %v276_v38 }
 0x129   :  { %1476 = vmatpush1.bf16.msra.mxu1 %v2574_v41  ;;  %v281_v41 = vrot.slane %v2881_v56, %v280_v39 }
 0x12a   :  { %1477 = vmatprep.subr.bf16.mxu1 %v2579_v42 }
 0x12d   :  { %1478 = vmatpush1.bf16.msra.mxu1 %v2577_v43 }
 0x12e   :  { %1479 = vmatprep.subr.bf16.mxu1 %v2582_v44 }
 0x131   :  { %1480 = vmatpush1.bf16.msra.mxu1 %v2580_v45 }
 0x132   :  { %1481 = vmatprep.subr.bf16.mxu1 %v2585_v46 }
 0x135   :  { %1482 = vmatpush1.bf16.msra.mxu1 %v2583_v47 }
 0x138   :  { %1484 = vmatmul.mubr.bf16.vlgmr.msra.gmra.mrb[4].mxu1 %v2867_v15  ;;  %v269_v15 = vrot.slane %v2881_v56, %v268_v55  ;;  %v1573_v56 = vrot.slane %v1564_v53, %v272_v57 }
 0x14b   :  { %v1280_v48 = vpop.f32.mrb[0].mxu1 }
 0x14c   :  { %v1282_v49 = vpop.f32.mrb[1].mxu1  ;;  %v1281_v59 = vadd.f32 %v1280_v48, %v269_v15  ;;  %v1569_v15 = vrot.slane %v1564_v53, %v268_v55 }
 0x14d   :  { %v1284_v50 = vpop.f32.mrb[2].mxu1  ;;  %v1283_v60 = vadd.f32 %v1282_v49, %v273_v58 }
 0x14e   :  { %v1285_v51 = vpop.f32.mrb[3].mxu1 }
 0x18c   :  { %v1362_v61 = vpop.f32.mrb[0].mxu0 }
 0x18d   :  { %v2266_v62 = vadd.f32 %v1362_v61, %v1281_v59  ;;  %v1364_v63 = vpop.f32.mrb[1].mxu0 }
 0x18e   :  { %v2268_v0 = vadd.f32 %v1364_v63, %v1283_v60  ;;  %v1366_v1 = vpop.f32.mrb[2].mxu0 }
 0x18f   :  { %v1492_v2 = vmax.f32 %v2266_v62, 0.0  ;;  %v1367_v3 = vpop.f32.mrb[3].mxu0 }
 0x190   :  { %v1493_v4 = vmax.f32 %v2268_v0, 0.0  ;;  %v2784_v0 = vmov 0.0  }
 0x191   :  { %v1496_v7 = vpack.c.bf16 %v1492_v2, %v1492_v2 }
 0x192   :  { %v1497_v5 = vpack.c.bf16 %v1493_v4, %v1493_v4 }
 0x194   :  { %1928 = vmatprep.mubr.bf16.mxu0 %v1497_v5 }
 0x195   :  { %1929 = vmatmul.mubr.bf16.vlgmr.msra.gmra.mrb[4].mxu0 %v1496_v7 }
 0x196   :  { %1938 = vmatpush1.bf16.msra.mxu0 %v2634_v6 }
 0x197   :  { %1939 = vmatprep.subr.bf16.mxu0 %v2639_v9 }
 0x19a   :  { %1940 = vmatpush1.bf16.msra.mxu0 %v2637_v10 }
 0x19b   :  { %1941 = vmatprep.subr.bf16.mxu0 %v2642_v12 }
 0x19e   :  { %1942 = vmatpush1.bf16.msra.mxu0 %v2640_v13 }
 0x19f   :  { %1943 = vmatprep.subr.bf16.mxu0 %v2645_v14 }
 0x1a2   :  { %1944 = vmatpush1.bf16.msra.mxu0 %v2643_v16 }
 0x1a3   :  { %1945 = vmatprep.subr.bf16.mxu0 %v2648_v17 }
 0x1a6   :  { %1946 = vmatpush1.bf16.msra.mxu0 %v2646_v18 }
 0x1a7   :  { %1947 = vmatprep.subr.bf16.mxu0 %v2651_v19 }
 0x1aa   :  { %1948 = vmatpush1.bf16.msra.mxu0 %v2649_v11 }
 0x1ab   :  { %1949 = vmatprep.subr.bf16.mxu0 %v2654_v20 }
 0x1ae   :  { %1950 = vmatpush1.bf16.msra.mxu0 %v2652_v35 }
 0x1af   :  { %1951 = vmatprep.subr.bf16.mxu0 %v2657_v21 }
 0x1b2   :  { %1952 = vmatpush1.bf16.msra.mxu0 %v2655_v22 }
 0x1b3   :  { %1953 = vmatprep.subr.bf16.mxu0 %v2660_v23 }
 0x1b6   :  { %1954 = vmatpush1.bf16.msra.mxu0 %v2658_v24 }
 0x1b7   :  { %1955 = vmatprep.subr.bf16.mxu0 %v2663_v25 }
 0x1ba   :  { %1956 = vmatpush1.bf16.msra.mxu0 %v2661_v26 }
 0x1bb   :  { %1957 = vmatprep.subr.bf16.mxu0 %v2666_v27 }
 0x1be   :  { %1958 = vmatpush1.bf16.msra.mxu0 %v2664_v8 }
 0x1bf   :  { %1959 = vmatprep.subr.bf16.mxu0 %v2669_v52 }
 0x1c2   :  { %1960 = vmatpush1.bf16.msra.mxu0 %v2667_v28 }
 0x1c3   :  { %1961 = vmatprep.subr.bf16.mxu0 %v2672_v29 }
 0x1c6   :  { %1962 = vmatpush1.bf16.msra.mxu0 %v2670_v30 }
 0x1c7   :  { %1963 = vmatprep.subr.bf16.mxu0 %v2675_v31 }
 0x1ca   :  { %1964 = vmatpush1.bf16.msra.mxu0 %v2673_v32 }
 0x1cb   :  { %1965 = vmatprep.subr.bf16.mxu0 %v2678_v33 }
 0x1ce   :  { %1966 = vmatpush1.bf16.msra.mxu0 %v2676_v34 }
 0x1cf   :  { %1967 = vmatprep.subr.bf16.mxu0 %v2681_v36 }
 0x1d2   :  { %1968 = vmatpush1.bf16.msra.mxu0 %v2679_v37 }
 0x20b   :  { %v1485_v42 = vpop.f32.mrb[4].mxu1 }
 0x20c   :  { %v2269_v43 = vadd.f32 %v1485_v42, %v277_v40  ;;  %v1487_v44 = vpop.f32.mrb[5].mxu1 }
 0x20d   :  { %v2270_v45 = vadd.f32 %v1487_v44, %v281_v41  ;;  %v1489_v46 = vpop.f32.mrb[6].mxu1 }
 0x20e   :  { %v1494_v47 = vmax.f32 %v2269_v43, 0.0  ;;  %v1490_v48 = vpop.f32.mrb[7].mxu1 }
 0x20f   :  { %v1495_v49 = vmax.f32 %v2270_v45, 0.0 }
 0x210   :  { %v1498_v51 = vpack.c.bf16 %v1494_v47, %v1494_v47 }
 0x211   :  { %v1499_v50 = vpack.c.bf16 %v1495_v49, %v1495_v49 }
 0x213   :  { %1969 = vmatprep.mubr.bf16.mxu0 %v1499_v50 }
 0x214   :  { %1970 = vmatmul.mubr.bf16.vlgmr.msra.gmra.mrb[4].mxu0 %v1498_v51 }
 0x2e7   :  { %v1971_v58 = vpop.f32.mrb[4].mxu0 }
 0x2e8   :  { %v2271_v59 = vadd.f32 %v1971_v58, %v1569_v15  ;;  %v1973_v60 = vpop.f32.mrb[5].mxu0 }
 0x2e9   :  { %v2272_v61 = vadd.f32 %v1973_v60, %v1573_v56  ;;  %v1975_v62 = vpop.f32.mrb[6].mxu0 }
 0x2ea   :  { %vm1978_vm0 = vcmp.gt.f32.partialorder %v2271_v59, 0.0  ;;  %v1976_v63 = vpop.f32.mrb[7].mxu0 }
 0x2eb   :  { %v1980_v1 = vsel %vm1978_vm0, 1.0, %v2784_v0  ;;  %vm1979_vm1 = vcmp.gt.f32.partialorder %v2272_v61, 0.0 }
 0x2ec   :  { %v1981_v2 = vsel %vm1979_vm1, 1.0, %v2784_v0 }
 0x2ed   :  { %v2264_v3 = vpack.c.bf16 %v1981_v2, %v1980_v1 }
 0x2ef   :  { %1990 = vst [vmem:[#allocation8] sm:$0xff] %v2264_v3 }
 0x2f0   :  { %2759 = shalt.err (!%p2756_p0)
}
 0x2f1   :  { %s2760_s12 = scalar_lea.hbm %s2918_s5, 128 }
 0x2f2   :  { %p2761_p1 = scmp.ne.s32.totalorder %s2918_s5, %s2760_s12  ;;  %p2764_p2 = scmp.lt.u32.totalorder %s2760_s12, %s2918_s5 }
 0x2f4   :  { %p2766_p3 = pnand %p2764_p2, %p2761_p1 }
 0x2f6   :  { %2769 = shalt.err (!%p2766_p3)
}
 0x2f7   :  { %2000 = dma.vmem_to_hbm [thread:$0]  %s1998_s9, 128, %s2918_s5, [#allocation4]  }
 0x2f8   :  { %2774 = dma.done.wait [#allocation4], 128  }
 0x2f9   :  { %2775 = vsyncadd [#allocation4], 4294967168 }
 0x2fa   :  { %2004 = vsyncpa [#allocation3], 1 }
 0x2fb   :  { %2005 = vsyncpa [#allocation6], 1 }
 0x2fc   :  { %2006 = vsyncpa [#allocation4], 1 }

</bundles_post_ra>
